<compile_context>
chip_gen: v7x
topology: tpu7x:2x2x1
jax: 0.10.0
libtpu: 0.0.40
codegen_flags: <defaults>
</compile_context>

<pallas_src>
import math
from functools import partial

import jax
import jax.numpy as jnp
from jax.experimental import pallas as pl
from jax.experimental.pallas import tpu as pltpu


def _round_up(x, m):
    return (x + m - 1) // m * m


# ----------------------------------------------------------------------------
# Pallas kernel
# ----------------------------------------------------------------------------
def _mlp_kernel(x_ref, w_ref, out_ref, *, num_layers, d0, last_dim, lane_width,
                matmul_dtype):
    """x_ref:   (TB, d0)        activation batch tile (bf16/f32)
       w_ref:   (LW+pad, L*LW)  packed weight/bias slab, f32, resident in VMEM
       out_ref: (TB, LW)        lane-dense packed output [latent | score bcast]
    """
    lw = lane_width
    bias_row, wout_row, bout_row = lw, lw + 1, lw + 2

    h = x_ref[...].astype(jnp.float32)                 # elementwise path in f32
    d_in = d0
    for i in range(num_layers):
        col = i * lw
        w = w_ref[0:d_in, col:col + lw].astype(matmul_dtype)   # [d_in, LW]
        b = w_ref[bias_row:bias_row + 1, col:col + lw]          # [1, LW] f32
        acc = jnp.dot(h.astype(matmul_dtype), w,
                      preferred_element_type=jnp.float32)       # MXU, f32 acc
        h = jnp.maximum(acc + b, 0.0)                           # [TB, LW]
        d_in = lw                                               # padded width

    # final Linear(last_dim -> 1): VPU multiply + XLU lane reduction (no MXU)
    w_out = w_ref[wout_row:wout_row + 1, 0:lw]                  # [1, LW] (zero padded)
    b_out = w_ref[bout_row:bout_row + 1, 0:1]                   # [1, 1]
    s = jnp.sum(h * w_out, axis=-1, keepdims=True) + b_out      # [TB, 1]
    sig = jax.nn.sigmoid(s)                                     # EUP

    # lane-dense packed store: lanes [0, last_dim) = latent, rest = score bcast
    lane = jax.lax.broadcasted_iota(jnp.int32, h.shape, 1)
    out_ref[...] = jnp.where(lane < last_dim, h,
                             jnp.broadcast_to(sig, h.shape))


# ----------------------------------------------------------------------------
# Weight packing + wrapper
# ----------------------------------------------------------------------------
def _pack_weight_slab(hidden_params, out_w, out_b, lane_width):
    """One f32 slab: layer i's weight lives in rows [0, in_i) of the 128-wide
    column block i*LW:(i+1)*LW (zero padded); row LW = biases, row LW+1 = out
    weight (as a row), row LW+2 col 0 = out bias."""
    lw = lane_width
    num_layers = len(hidden_params)
    bias_row, wout_row, bout_row = lw, lw + 1, lw + 2
    rows = _round_up(lw + 3, 8)
    cols = num_layers * lw
    slab = jnp.zeros((rows, cols), jnp.float32)
    for i, (w, b) in enumerate(hidden_params):
        col = i * lw
        slab = slab.at[0:w.shape[0], col:col + w.shape[1]].set(w)
        slab = slab.at[bias_row, col:col + w.shape[1]].set(b.reshape(-1))
    slab = slab.at[wout_row, 0:out_w.shape[0]].set(out_w.reshape(-1))
    slab = slab.at[bout_row, 0].set(out_b.reshape(()))
    return slab


def mlp_forward(latent_vector, hidden_params, out_w, out_b, *,
                block_batch=512, matmul_dtype=jnp.bfloat16):
    """latent_vector: [B, D0] (concatenated user/item embeddings)
       hidden_params: list of (W [in,out], b [1,out]); out_w: [last,1]; out_b: [1,1]
       returns (score [B,1] f32, latent [B,last] f32)"""
    B, d0 = latent_vector.shape
    num_layers = len(hidden_params)
    last_dim = hidden_params[-1][0].shape[1]
    lane_width = _round_up(max([d0] + [w.shape[1] for w, _ in hidden_params]), 128)

    # batch tile: multiple of 8, pad B up to a multiple of the tile
    tb = min(block_batch, _round_up(B, 8))
    b_pad = _round_up(B, tb)

    x = latent_vector.astype(matmul_dtype)
    if b_pad != B:
        x = jnp.pad(x, ((0, b_pad - B), (0, 0)))

    slab = _pack_weight_slab(hidden_params, out_w, out_b, lane_width)

    # advisory cost estimate (natural, unpadded dims)
    flops = 0
    d_in = d0
    for w, _ in hidden_params:
        flops += 2 * b_pad * d_in * w.shape[1]
        d_in = w.shape[1]
    flops += 3 * b_pad * last_dim
    bytes_accessed = (x.size * x.dtype.itemsize
                      + slab.size * slab.dtype.itemsize
                      + b_pad * lane_width * 4)

    kernel = partial(_mlp_kernel, num_layers=num_layers, d0=d0,
                     last_dim=last_dim, lane_width=lane_width,
                     matmul_dtype=matmul_dtype)

    packed = pl.pallas_call(
        kernel,
        grid=(b_pad // tb,),
        in_specs=[
            pl.BlockSpec((tb, d0), lambda i: (i, 0)),        # batch tile (pipelined)
            pl.BlockSpec(slab.shape, lambda i: (0, 0)),       # weights: resident
        ],
        out_specs=pl.BlockSpec((tb, lane_width), lambda i: (i, 0)),
        out_shape=jax.ShapeDtypeStruct((b_pad, lane_width), jnp.float32),
        compiler_params=pltpu.CompilerParams(
            dimension_semantics=("parallel",)),
        cost_estimate=pl.CostEstimate(flops=flops, transcendentals=b_pad,
                                      bytes_accessed=bytes_accessed),
    )(x, slab)

    latent = packed[:B, :last_dim]
    score = packed[:B, last_dim:last_dim + 1]
    return score, latent


# ----------------------------------------------------------------------------
# Parameter construction (deterministic, mirrors MLP.weight_init)
# ----------------------------------------------------------------------------
def init_params(key, num_users, num_items, latent_dim, num_layers):
    keys = jax.random.split(key, 3 + num_layers)

    # embeddings ~ N(0, 0.01)
    user_embed = 0.01 * jax.random.normal(
        keys[0], (num_users, latent_dim // 2), jnp.float32)
    item_embed = 0.01 * jax.random.normal(
        keys[1], (num_items, latent_dim // 2), jnp.float32)

    hidden_params = []
    in_dim = latent_dim
    for i in range(num_layers):
        out_dim = in_dim // 2
        # xavier_uniform over torch (out,in) weight; stored here as [in, out]
        bound = math.sqrt(6.0 / (in_dim + out_dim))
        w = jax.random.uniform(keys[2 + i], (in_dim, out_dim), jnp.float32,
                               minval=-bound, maxval=bound)
        b = jnp.zeros((1, out_dim), jnp.float32)
        hidden_params.append((w, b))
        in_dim = out_dim

    # kaiming_uniform(a=1) on torch weight (1, in_dim): bound = sqrt(3/in_dim)
    bound = math.sqrt(3.0 / in_dim)
    out_w = jax.random.uniform(keys[-1], (in_dim, 1), jnp.float32,
                               minval=-bound, maxval=bound)
    out_b = jnp.zeros((1, 1), jnp.float32)

    return user_embed, item_embed, hidden_params, out_w, out_b


def model_forward(user_idx, item_idx, params):
    user_embed, item_embed, hidden_params, out_w, out_b = params
    # TODO(synk): for large batches, fuse this gather+concat into the kernel
    # (scalar-prefetch row gather) so latent0 never round-trips through HBM.
    u = jnp.take(user_embed, user_idx, axis=0)
    v = jnp.take(item_embed, item_idx, axis=0)
    latent0 = jnp.concatenate([u, v], axis=1)
    return mlp_forward(latent0, hidden_params, out_w, out_b)


# ----------------------------------------------------------------------------
if __name__ == "__main__":
    # config: {'num_layers_mlp': 3, 'latent_dim_mlp': 32, 'pretrained': False}
    num_users, num_items = 10, 12
    latent_dim, num_layers = 32, 3
    batch = 8

    key = jax.random.PRNGKey(0)
    pkey, ukey, ikey = jax.random.split(key, 3)

    params = init_params(pkey, num_users, num_items, latent_dim, num_layers)

    user = jax.random.randint(ukey, (batch,), 0, num_users, dtype=jnp.int32)
    item = jax.random.randint(ikey, (batch,), 0, num_items, dtype=jnp.int32)

    fwd = jax.jit(model_forward)
    score, latent = fwd(user, item, params)
    jax.block_until_ready((score, latent))

    # ---- references -------------------------------------------------------
    u = jnp.take(params[0], user, axis=0)
    v = jnp.take(params[1], item, axis=0)
    x0 = jnp.concatenate([u, v], axis=1)

    # (a) reference with the same numerics as the kernel (bf16 matmul operands,
    #     f32 accumulate/elementwise)
    h = x0.astype(jnp.bfloat16).astype(jnp.float32)
    for w, b in params[2]:
        h = jnp.maximum(
            jnp.dot(h.astype(jnp.bfloat16), w.astype(jnp.bfloat16),
                    preferred_element_type=jnp.float32) + b, 0.0)
    ref_latent = h
    ref_score = jax.nn.sigmoid(
        jnp.sum(h * params[3].reshape(1, -1), axis=-1, keepdims=True) + params[4])

    # (b) full-f32 reference (original torch semantics)
    hf = x0
    for w, b in params[2]:
        hf = jnp.maximum(hf @ w + b, 0.0)
    ref_latent_f32 = hf
    ref_score_f32 = jax.nn.sigmoid(hf @ params[3] + params[4])

    last_dim = latent_dim // (2 ** num_layers)
    assert score.shape == (batch, 1) and latent.shape == (batch, last_dim)
    assert jnp.allclose(latent, ref_latent, atol=1e-5)
    assert jnp.allclose(score, ref_score, atol=1e-5)
    assert jnp.allclose(latent, ref_latent_f32, atol=1e-3)
    assert jnp.allclose(score, ref_score_f32, atol=1e-3)

    print("KERNEL_OK")
</pallas_src>

<mosaic_0001>
module attributes {stable_mosaic.version = 11 : i64} {
  func.func @_mlp_kernel(%arg0: i32, %arg1: memref<8x32xbf16, #tpu.memory_space<vmem>>, %arg2: memref<136x384xf32, #tpu.memory_space<vmem>>, %arg3: memref<8x128xf32, #tpu.memory_space<vmem>>) attributes {dimension_semantics = [#tpu.dimension_semantics<parallel>], iteration_bounds = array<i64: 1>, scalar_prefetch = 0 : i64, scratch_operands = 0 : i64, tpu.core_type = #tpu.core_type<tc>, window_params = [{transform_indices = @transform_0, window_bounds = array<i64: 8, 32>}, {pipeline_mode = #tpu.pipeline_mode<synchronous>, transform_indices = @transform_1, window_bounds = array<i64: 136, 384>}, {transform_indices = @transform_2, window_bounds = array<i64: 8, 128>}]} {
    %c0 = arith.constant 0 : index
    %c0_0 = arith.constant 0 : index
    %0 = vector.load %arg1[%c0, %c0_0] : memref<8x32xbf16, #tpu.memory_space<vmem>>, vector<8x32xbf16>
    %1 = arith.extf %0 : vector<8x32xbf16> to vector<8x32xf32>
    %c0_1 = arith.constant 0 : index
    %c0_2 = arith.constant 0 : index
    %2 = vector.load %arg2[%c0_1, %c0_2] : memref<136x384xf32, #tpu.memory_space<vmem>>, vector<32x128xf32>
    %3 = arith.truncf %2 : vector<32x128xf32> to vector<32x128xbf16>
    %c128 = arith.constant 128 : index
    %c0_3 = arith.constant 0 : index
    %4 = vector.load %arg2[%c128, %c0_3] : memref<136x384xf32, #tpu.memory_space<vmem>>, vector<1x128xf32>
    %5 = arith.truncf %1 : vector<8x32xf32> to vector<8x32xbf16>
    %cst = arith.constant dense<0.000000e+00> : vector<8x128xf32>
    %6 = tpu.matmul %5, %3, %cst {dimension_numbers = #tpu.dot_dimension_numbers<[1], [0], [0], [1], [0, 0, 1, 1], [], []>} : vector<8x32xbf16>, vector<32x128xbf16>, vector<8x128xf32> -> vector<8x128xf32>
    %7 = vector.broadcast %4 : vector<1x128xf32> to vector<8x128xf32>
    %8 = arith.addf %6, %7 : vector<8x128xf32>
    %cst_4 = arith.constant 0.000000e+00 : f32
    %9 = vector.broadcast %cst_4 : f32 to vector<8x128xf32>
    %10 = arith.maximumf %8, %9 : vector<8x128xf32>
    %c0_5 = arith.constant 0 : index
    %c128_6 = arith.constant 128 : index
    %11 = vector.load %arg2[%c0_5, %c128_6] : memref<136x384xf32, #tpu.memory_space<vmem>>, vector<128x128xf32>
    %12 = arith.truncf %11 : vector<128x128xf32> to vector<128x128xbf16>
    %c128_7 = arith.constant 128 : index
    %c128_8 = arith.constant 128 : index
    %13 = vector.load %arg2[%c128_7, %c128_8] : memref<136x384xf32, #tpu.memory_space<vmem>>, vector<1x128xf32>
    %14 = arith.truncf %10 : vector<8x128xf32> to vector<8x128xbf16>
    %cst_9 = arith.constant dense<0.000000e+00> : vector<8x128xf32>
    %15 = tpu.matmul %14, %12, %cst_9 {dimension_numbers = #tpu.dot_dimension_numbers<[1], [0], [0], [1], [0, 0, 1, 1], [], []>} : vector<8x128xbf16>, vector<128x128xbf16>, vector<8x128xf32> -> vector<8x128xf32>
    %16 = vector.broadcast %13 : vector<1x128xf32> to vector<8x128xf32>
    %17 = arith.addf %15, %16 : vector<8x128xf32>
    %cst_10 = arith.constant 0.000000e+00 : f32
    %18 = vector.broadcast %cst_10 : f32 to vector<8x128xf32>
    %19 = arith.maximumf %17, %18 : vector<8x128xf32>
    %c0_11 = arith.constant 0 : index
    %c256 = arith.constant 256 : index
    %20 = vector.load %arg2[%c0_11, %c256] : memref<136x384xf32, #tpu.memory_space<vmem>>, vector<128x128xf32>
    %21 = arith.truncf %20 : vector<128x128xf32> to vector<128x128xbf16>
    %c128_12 = arith.constant 128 : index
    %c256_13 = arith.constant 256 : index
    %22 = vector.load %arg2[%c128_12, %c256_13] : memref<136x384xf32, #tpu.memory_space<vmem>>, vector<1x128xf32>
    %23 = arith.truncf %19 : vector<8x128xf32> to vector<8x128xbf16>
    %cst_14 = arith.constant dense<0.000000e+00> : vector<8x128xf32>
    %24 = tpu.matmul %23, %21, %cst_14 {dimension_numbers = #tpu.dot_dimension_numbers<[1], [0], [0], [1], [0, 0, 1, 1], [], []>} : vector<8x128xbf16>, vector<128x128xbf16>, vector<8x128xf32> -> vector<8x128xf32>
    %25 = vector.broadcast %22 : vector<1x128xf32> to vector<8x128xf32>
    %26 = arith.addf %24, %25 : vector<8x128xf32>
    %cst_15 = arith.constant 0.000000e+00 : f32
    %27 = vector.broadcast %cst_15 : f32 to vector<8x128xf32>
    %28 = arith.maximumf %26, %27 : vector<8x128xf32>
    %c129 = arith.constant 129 : index
    %c0_16 = arith.constant 0 : index
    %29 = vector.load %arg2[%c129, %c0_16] : memref<136x384xf32, #tpu.memory_space<vmem>>, vector<1x128xf32>
    %c130 = arith.constant 130 : index
    %c0_17 = arith.constant 0 : index
    %30 = vector.load %arg2[%c130, %c0_17] : memref<136x384xf32, #tpu.memory_space<vmem>>, vector<1x1xf32>
    %31 = vector.broadcast %29 : vector<1x128xf32> to vector<8x128xf32>
    %32 = arith.mulf %28, %31 : vector<8x128xf32>
    %cst_18 = arith.constant dense<0.000000e+00> : vector<8xf32>
    %33 = vector.multi_reduction <add>, %32, %cst_18 [1] : vector<8x128xf32> to vector<8xf32>
    %34 = vector.shape_cast %33 : vector<8xf32> to vector<8x1xf32>
    %35 = vector.broadcast %30 : vector<1x1xf32> to vector<8x1xf32>
    %36 = arith.addf %34, %35 : vector<8x1xf32>
    %37 = arith.negf %36 : vector<8x1xf32>
    %38 = math.exp %37 : vector<8x1xf32>
    %cst_19 = arith.constant 1.000000e+00 : f32
    %39 = vector.broadcast %cst_19 : f32 to vector<8x1xf32>
    %40 = arith.addf %39, %38 : vector<8x1xf32>
    %41 = arith.divf %39, %40 : vector<8x1xf32>
    %42 = tpu.iota {dimensions = array<i32: 1>} : vector<8x128xi32>
    %c4_i32 = arith.constant 4 : i32
    %43 = vector.broadcast %c4_i32 : i32 to vector<8x128xi32>
    %44 = arith.cmpi slt, %42, %43 : vector<8x128xi32>
    %45 = vector.shape_cast %41 : vector<8x1xf32> to vector<8x1xf32>
    %46 = vector.broadcast %45 : vector<8x1xf32> to vector<8x128xf32>
    %47 = arith.select %44, %28, %46 : vector<8x128xi1>, vector<8x128xf32>
    %c0_20 = arith.constant 0 : index
    %c0_21 = arith.constant 0 : index
    %48 = vector.load %arg3[%c0_20, %c0_21] : memref<8x128xf32, #tpu.memory_space<vmem>>, vector<8x128xf32>
    tpu.vector_store %arg3[%c0_20, %c0_21], %47 {strides = array<i32>} : memref<8x128xf32, #tpu.memory_space<vmem>>, vector<8x128xf32>,
    return
  }
  func.func @transform_0(%arg0: i32) -> (i32, i32) {
    %c0_i32 = arith.constant 0 : i32
    %c0_i32_0 = arith.constant 0 : i32
    return %arg0, %c0_i32 : i32, i32
  }
  func.func @transform_1(%arg0: i32) -> (i32, i32) {
    %c0_i32 = arith.constant 0 : i32
    %c0_i32_0 = arith.constant 0 : i32
    %c0_i32_1 = arith.constant 0 : i32
    return %c0_i32, %c0_i32_0 : i32, i32
  }
  func.func @transform_2(%arg0: i32) -> (i32, i32) {
    %c0_i32 = arith.constant 0 : i32
    %c0_i32_0 = arith.constant 0 : i32
    return %arg0, %c0_i32 : i32, i32
  }
}

</mosaic_0001>

<bundles_post_ra>
// kernel: model_forward.1
= control target key start
LH: loop header
LB: loop body
LE: loop exit
PB: predicated region body
PF: predicated region fallthrough
CT: control target
= control target key end

     0   :  { %v304_v0 = vmov 0.0   ;;  %vm305_vm0 = vmmov 0   ;;  %vm20_vm1 = vcmask 261120   ;;  %s475_s1 = inlined_call_operand.vmem [shape: f32[136,384], index: 1, kind: input, shape index: {}]   ;;  %s476_s0 = inlined_call_operand.vmem [shape: bf16[8,32], index: 0, kind: input, shape index: {}]   ;;  %s477_s2 = inlined_call_operand.vmem [shape: f32[8,128], index: 2, kind: output, shape index: {}]  }
   0x1   :  { %248 = vmatprep.subr.bf16.mxu0 %v304_v0  ;;  %v13_v1 = vld [vmem:[%s475_s1] sm:$0xff]  ;;  %v14_v2 = vld [vmem:[%s475_s1 + $0x18] sm:$0xff]  ;;  %v15_v3 = vld [vmem:[%s475_s1 + $0x30] sm:$0xff]  ;;  %252 = vmatprep.mubr.msk.bf16.mxu0 %vm305_vm0, %v304_v0 }
   0x2   :  { %v17_v4 = vpack.c.bf16 %v14_v2, %v13_v1  ;;  %v16_v5 = vld [vmem:[%s475_s1 + $0x48] sm:$0xff]  ;;  %256 = vmatprep.subr.bf16.mxu1 %v304_v0  ;;  %272 = vmatprep.mubr.msk.bf16.mxu1 %vm305_vm0, %v304_v0  ;;  %v66_v7 = vld [vmem:[%s475_s1 + $0x20] sm:$0xff]  ;;  %v67_v8 = vld [vmem:[%s475_s1 + $0x38] sm:$0xff] }
   0x3   :  { %v65_v6 = vld [vmem:[%s475_s1 + $0x8] sm:$0xff]  ;;  %v68_v9 = vld [vmem:[%s475_s1 + $0x50] sm:$0xff]  ;;  %v18_v10 = vpack.c.bf16 %v16_v5, %v15_v3  ;;  %v70_v14 = vld [vmem:[%s475_s1 + $0x80] sm:$0xff] }
   0x4   :  { %249 = vmatpush3.bf16.msra.mxu0 %v17_v4  ;;  %v81_v11 = vpack.c.bf16 %v66_v7, %v65_v6  ;;  %v82_v12 = vpack.c.bf16 %v68_v9, %v67_v8  ;;  %v69_v13 = vld [vmem:[%s475_s1 + $0x68] sm:$0xff]  ;;  %v12_v15 = vld [vmem:[%s476_s0] sm:$0xf]  ;;  %v71_v17 = vld [vmem:[%s475_s1 + $0x98] sm:$0xff] }
   0x5   :  { %250 = vmatprep.subr.bf16.mxu0 %v304_v0  ;;  %v83_v16 = vpack.c.bf16 %v70_v14, %v69_v13  ;;  %v72_v18 = vld [vmem:[%s475_s1 + $0xb0] sm:$0xff]  ;;  %v73_v20 = vld [vmem:[%s475_s1 + $0xc8] sm:$0xff]  ;;  %v74_v21 = vld [vmem:[%s475_s1 + $0xe0] sm:$0xff] }
   0x6   :  { %257 = vmatpush3.bf16.msra.mxu1 %v81_v11  ;;  %v84_v19 = vpack.c.bf16 %v72_v18, %v71_v17  ;;  %v85_v22 = vpack.c.bf16 %v74_v21, %v73_v20  ;;  %v75_v23 = vld [vmem:[%s475_s1 + $0xf8] sm:$0xff]  ;;  %v76_v24 = vld [vmem:[%s475_s1 + $0x110] sm:$0xff]  ;;  %v77_v26 = vld [vmem:[%s475_s1 + $0x128] sm:$0xff]  ;;  %v306_v17 = vmov 0  }
   0x7   :  { %258 = vmatprep.subr.bf16.mxu1 %v304_v0  ;;  %v86_v25 = vpack.c.bf16 %v76_v24, %v75_v23  ;;  %v78_v27 = vld [vmem:[%s475_s1 + $0x140] sm:$0xff]  ;;  %v79_v29 = vld [vmem:[%s475_s1 + $0x158] sm:$0xff]  ;;  %v80_v30 = vld [vmem:[%s475_s1 + $0x170] sm:$0xff]  ;;  %299 = vset.pattern.permute.xlu0 %v306_v17 }
   0x8   :  { %251 = vmatpush3.bf16.msra.mxu0 %v18_v10  ;;  %v87_v28 = vpack.c.bf16 %v78_v27, %v77_v26  ;;  %v88_v31 = vpack.c.bf16 %v80_v30, %v79_v29  ;;  %v132_v32 = vld [vmem:[%s475_s1 + $0x10] sm:$0xff]  ;;  %v133_v33 = vld [vmem:[%s475_s1 + $0x28] sm:$0xff]  ;;  %v134_v34 = vld [vmem:[%s475_s1 + $0x40] sm:$0xff] }
   0x9   :  { %276 = vmatprep.subr.bf16.mxu0 %v304_v0  ;;  %v148_v35 = vpack.c.bf16 %v133_v33, %v132_v32  ;;  %v135_v36 = vld [vmem:[%s475_s1 + $0x58] sm:$0xff]  ;;  %v136_v38 = vld [vmem:[%s475_s1 + $0x70] sm:$0xff]  ;;  %v137_v39 = vld [vmem:[%s475_s1 + $0x88] sm:$0xff] }
   0xa   :  { %259 = vmatpush3.bf16.msra.mxu1 %v82_v12  ;;  %v149_v37 = vpack.c.bf16 %v135_v36, %v134_v34  ;;  %v150_v40 = vpack.c.bf16 %v137_v39, %v136_v38  ;;  %v138_v41 = vld [vmem:[%s475_s1 + $0xa0] sm:$0xff]  ;;  %v139_v42 = vld [vmem:[%s475_s1 + $0xb8] sm:$0xff]  ;;  %v140_v44 = vld [vmem:[%s475_s1 + $0xd0] sm:$0xff] }
   0xb   :  { %253 = vmatmul.mubr.msk.bf16.vlgmr.msra.gmra.mrb[0].mxu0 %vm20_vm1, %v12_v15  ;;  %260 = vmatprep.subr.bf16.mxu1 %v304_v0  ;;  %v151_v43 = vpack.c.bf16 %v139_v42, %v138_v41  ;;  %v141_v45 = vld [vmem:[%s475_s1 + $0xe8] sm:$0xff]  ;;  %v142_v47 = vld [vmem:[%s475_s1 + $0x100] sm:$0xff]  ;;  %v143_v48 = vld [vmem:[%s475_s1 + $0x118] sm:$0xff] }
   0xc   :  { %292 = vmatprep.mubr.msk.bf16.mxu0 %vm305_vm0, %v304_v0  ;;  %277 = vmatpush3.bf16.msra.mxu0 %v148_v35  ;;  %v152_v46 = vpack.c.bf16 %v141_v45, %v140_v44  ;;  %v153_v49 = vpack.c.bf16 %v143_v48, %v142_v47  ;;  %v19_v50 = vld [vmem:[%s475_s1 + $0x180] ss:$0 sm:$0xff]  ;;  %v144_v58 = vld [vmem:[%s475_s1 + $0x130] sm:$0xff]  ;;  %v145_v59 = vld [vmem:[%s475_s1 + $0x148] sm:$0xff] }
   0xd   :  { %278 = vmatprep.subr.bf16.mxu0 %v304_v0  ;;  %v154_v60 = vpack.c.bf16 %v145_v59, %v144_v58  ;;  %v146_v61 = vld [vmem:[%s475_s1 + $0x160] sm:$0xff]  ;;  %v147_v62 = vld [vmem:[%s475_s1 + $0x178] sm:$0xff]  ;;  %v89_v1 = vld [vmem:[%s475_s1 + $0x188] ss:$0 sm:$0xff] }
   0xe   :  { %261 = vmatpush3.bf16.msra.mxu1 %v83_v16  ;;  %v155_v63 = vpack.c.bf16 %v147_v62, %v146_v61  ;;  %v156_v8 = vld [vmem:[%s475_s1 + $0x190] ss:$0 sm:$0xff]  ;;  %v199_v13 = vld [vmem:[%s475_s1 + $0x181] ss:$0 sm:$0xff]  ;;  %v200_v18 = vld [vmem:[%s475_s1 + $0x182] ss:$0 sm:$0xff] }
   0xf   :  { %262 = vmatprep.subr.bf16.mxu1 %v304_v0 }
  0x10   :  { %279 = vmatpush3.bf16.msra.mxu0 %v149_v37 }
  0x11   :  { %280 = vmatprep.subr.bf16.mxu0 %v304_v0 }
  0x12   :  { %263 = vmatpush3.bf16.msra.mxu1 %v84_v19 }
  0x13   :  { %264 = vmatprep.subr.bf16.mxu1 %v304_v0 }
  0x14   :  { %281 = vmatpush3.bf16.msra.mxu0 %v150_v40 }
  0x15   :  { %282 = vmatprep.subr.bf16.mxu0 %v304_v0 }
  0x16   :  { %265 = vmatpush3.bf16.msra.mxu1 %v85_v22 }
  0x17   :  { %266 = vmatprep.subr.bf16.mxu1 %v304_v0 }
  0x18   :  { %283 = vmatpush3.bf16.msra.mxu0 %v151_v43 }
  0x19   :  { %284 = vmatprep.subr.bf16.mxu0 %v304_v0 }
  0x1a   :  { %267 = vmatpush3.bf16.msra.mxu1 %v86_v25  ;;  %v211_v25 = vlaneseq }
  0x1b   :  { %268 = vmatprep.subr.bf16.mxu1 %v304_v0 }
  0x1c   :  { %285 = vmatpush3.bf16.msra.mxu0 %v152_v46  ;;  %v212_v26 = vand.u32 127, %v211_v25 }
  0x1d   :  { %286 = vmatprep.subr.bf16.mxu0 %v304_v0 }
  0x1e   :  { %269 = vmatpush3.bf16.msra.mxu1 %v87_v28  ;;  %vm213_vm2 = vcmp.lt.s32.totalorder %v212_v26, 4 }
  0x1f   :  { %270 = vmatprep.subr.bf16.mxu1 %v304_v0 }
  0x20   :  { %287 = vmatpush3.bf16.msra.mxu0 %v153_v49 }
  0x21   :  { %288 = vmatprep.subr.bf16.mxu0 %v304_v0 }
  0x22   :  { %271 = vmatpush3.bf16.msra.mxu1 %v88_v31 }
  0x24   :  { %289 = vmatpush3.bf16.msra.mxu0 %v154_v60 }
  0x25   :  { %290 = vmatprep.subr.bf16.mxu0 %v304_v0 }
  0x28   :  { %291 = vmatpush3.bf16.msra.mxu0 %v155_v63 }
  0xde   :  { %v58_v51 = vpop.f32.mrb[0].mxu0 }
  0xdf   :  { %v59_v52 = vadd.f32 %v58_v51, %v19_v50  ;;  %v254_v53 = vpop.f32.mrb[1].mxu0 }
  0xe0   :  { %v61_v54 = vpop.f32.mrb[2].mxu0 }
  0xe1   :  { %v64_v55 = vmax.f32 %v59_v52, 0.0  ;;  %v255_v56 = vpop.f32.mrb[3].mxu0 }
  0xe3   :  { %v90_v57 = vpack.c.bf16 %v64_v55, %v64_v55 }
  0xe5   :  { %273 = vmatmul.mubr.bf16.vlgmr.msra.gmra.mrb[0].mxu1 %v90_v57 }
 0x1b8   :  { %v125_v2 = vpop.f32.mrb[0].mxu1 }
 0x1b9   :  { %v126_v3 = vadd.f32 %v125_v2, %v89_v1  ;;  %v274_v4 = vpop.f32.mrb[1].mxu1 }
 0x1ba   :  { %v128_v5 = vpop.f32.mrb[2].mxu1 }
 0x1bb   :  { %v131_v6 = vmax.f32 %v126_v3, 0.0  ;;  %v275_v0 = vpop.f32.mrb[3].mxu1 }
 0x1bd   :  { %v157_v7 = vpack.c.bf16 %v131_v6, %v131_v6 }
 0x1bf   :  { %293 = vmatmul.mubr.bf16.vlgmr.msra.gmra.mrb[4].mxu0 %v157_v7 }
 0x292   :  { %v192_v9 = vpop.f32.mrb[4].mxu0 }
 0x293   :  { %v193_v10 = vadd.f32 %v192_v9, %v156_v8  ;;  %v294_v11 = vpop.f32.mrb[5].mxu0 }
 0x294   :  { %v195_v12 = vpop.f32.mrb[6].mxu0 }
 0x295   :  { %v198_v14 = vmax.f32 %v193_v10, 0.0  ;;  %v295_v15 = vpop.f32.mrb[7].mxu0 }
 0x297   :  { %v201_v16 = vmul.f32 %v199_v13, %v198_v14 }
 0x299   :  { %202 = vadd.xlane.f32.xlu0 %v201_v16 }
 0x326   :  { %v203_v19 = vpop.xlane.xlu0 %202 }
 0x327   :  { %v204_v20 = vadd.f32 %v203_v19, %v200_v18 }
 0x329   :  { %v226_v21 = vmul.f32 -1.442695, %v204_v20 }
 0x32b   :  { %300 = vpow2.f32 %v226_v21 }
 0x335   :  { %v301_v22 = vpop.eup %300 }
 0x336   :  { %v208_v23 = vadd.f32 1.0, %v301_v22 }
 0x338   :  { %302 = vrcp.f32 %v208_v23 }
 0x342   :  { %v303_v24 = vpop.eup %302 }
 0x343   :  { %216 = vperm.xlu0 %299, %v303_v24  }
 0x3c2   :  { %v217_v27 = vpop.permute.xlu0 %216 }
 0x3c3   :  { %v219_v28 = vsel %vm213_vm2, %v198_v14, %v217_v27 }
 0x3c4   :  { %220 = vst [vmem:[%s477_s2] sm:$0xff] %v219_v28 }

</bundles_post_ra>
